<compile_context>
chip_gen: v7x
topology: tpu7x:2x2x1
jax: 0.10.0
libtpu: 0.0.40
codegen_flags: <defaults>
</compile_context>

<pallas_src>
import functools

import jax
import jax.numpy as jnp
from jax.experimental import pallas as pl
from jax.experimental.pallas import tpu as pltpu


def _round_up(n, m):
    return ((n + m - 1) // m) * m


def slp_kernel(idx_ref, w1e_ref, w2_ref, b2_ref, out_ref):
    """Single-tile kernel: everything fits comfortably in VMEM at these sizes.

    idx_ref : (B, 1)    int32  last-token ids (precondition: 0 <= id < vocab_size)
    w1e_ref : (Vp, Hp)  f32    emb_table @ W1^T + b1, zero-padded
    w2_ref  : (Hp, Op)  f32    W2^T, zero-padded
    b2_ref  : (1, Op)   f32    b2, zero-padded
    out_ref : (B, Op)   f32
    """
    idx = idx_ref[...]                                            # (B, 1)
    B = idx.shape[0]
    Vp = w1e_ref.shape[0]

    # Embedding gather + fc1 + b1 as a single one-hot MXU matmul over the
    # pre-folded table (exact: exactly one 1.0 per row selects a W1e row;
    # zero-padded vocab rows are never selected).
    onehot = (jax.lax.broadcasted_iota(jnp.int32, (B, Vp), 1)
              == idx).astype(jnp.float32)                         # (B, Vp)
    h = jnp.tanh(jnp.dot(onehot, w1e_ref[...],
                         preferred_element_type=jnp.float32))     # (B, Hp)

    # fc2 (+ b2).  Padded hidden columns are exactly tanh(0)=0 and padded W2
    # rows are 0, so the padding contributes exactly nothing.
    out_ref[...] = (jnp.dot(h, w2_ref[...],
                            preferred_element_type=jnp.float32)
                    + b2_ref[...])                                # (B, Op)


def build_slp_params(emb_table, w1, b1, w2, b2):
    """One-time (model-build-time) preprocessing: fold + transpose + pad.  Exact."""
    V, _ = emb_table.shape
    H, _ = w1.shape
    O, _ = w2.shape
    Vp, Hp, Op = _round_up(V, 128), _round_up(H, 128), _round_up(O, 128)

    # Fold embedding table and fc1 (incl. b1) into one (V, H) table.
    w1e = emb_table.astype(jnp.float32) @ w1.T.astype(jnp.float32) + b1   # (V, H)
    w1e = jnp.zeros((Vp, Hp), jnp.float32).at[:V, :H].set(w1e)
    w2t = jnp.zeros((Hp, Op), jnp.float32).at[:H, :O].set(w2.T)
    b2p = jnp.zeros((1, Op), jnp.float32).at[0, :O].set(b2)
    return w1e, w2t, b2p, O


@functools.partial(jax.jit, static_argnames=("output_size",))
def slp_forward(x_ids, w1e, w2t, b2p, *, output_size):
    """x_ids: (B, S) int token ids.  Returns (B, output_size) float32."""
    B = x_ids.shape[0]
    Op = w2t.shape[1]
    # x.permute(1,0,2)[-1] == embedding of x[:, -1]
    idx_last = x_ids[:, -1].astype(jnp.int32).reshape(B, 1)

    vmem = pl.BlockSpec(memory_space=pltpu.MemorySpace.VMEM)
    out = pl.pallas_call(
        slp_kernel,
        out_shape=jax.ShapeDtypeStruct((B, Op), jnp.float32),
        in_specs=[vmem] * 4,
        out_specs=vmem,
    )(idx_last, w1e, w2t, b2p)
    return out[:, :output_size]


def slp_reference(x_ids, emb_table, w1, b1, w2, b2):
    """Pure-JAX transcription of the PyTorch forward (full path, then x[-1])."""
    emb = emb_table[x_ids]                    # (B, S, E)
    emb = jnp.transpose(emb, (1, 0, 2))       # (S, B, E)
    h = jnp.tanh(emb @ w1.T + b1)             # (S, B, H)
    return h[-1] @ w2.T + b2                  # (B, O)


if __name__ == "__main__":
    # Config (small, consistent with the module: hidden_size is fixed at 100)
    vocab_size = 64
    embedding_size = 32
    hidden_size = 100
    output_size = 8
    batch = 4
    seq = 8

    key = jax.random.PRNGKey(0)
    k_emb, k_w1, k_b1, k_w2, k_b2, k_x = jax.random.split(key, 6)

    emb_table = jax.random.normal(k_emb, (vocab_size, embedding_size), jnp.float32)
    w1 = jax.random.normal(k_w1, (hidden_size, embedding_size), jnp.float32) * 0.1
    b1 = jax.random.normal(k_b1, (hidden_size,), jnp.float32) * 0.1
    w2 = jax.random.normal(k_w2, (output_size, hidden_size), jnp.float32) * 0.1
    b2 = jax.random.normal(k_b2, (output_size,), jnp.float32) * 0.1

    # NOTE: precondition — token ids must lie in [0, vocab_size); out-of-range ids
    # would produce an all-zero one-hot row (reference would be an OOB gather).
    x_ids = jax.random.randint(k_x, (batch, seq), 0, vocab_size, jnp.int32)

    # One-time preprocessing (init time), then the jit'ed hot path.
    w1e, w2t, b2p, out_sz = build_slp_params(emb_table, w1, b1, w2, b2)

    out = slp_forward(x_ids, w1e, w2t, b2p, output_size=out_sz)
    out = jax.block_until_ready(out)

    ref = slp_reference(x_ids, emb_table, w1, b1, w2, b2)
    assert out.shape == (batch, output_size)
    assert jnp.allclose(out, ref, atol=1e-4, rtol=1e-4), "mismatch vs reference"

    print("KERNEL_OK")
</pallas_src>

<mosaic_0001>
module attributes {stable_mosaic.version = 11 : i64} {
  func.func @slp_kernel(%arg0: memref<4x1xi32, #tpu.memory_space<vmem>>, %arg1: memref<128x128xf32, #tpu.memory_space<vmem>>, %arg2: memref<128x128xf32, #tpu.memory_space<vmem>>, %arg3: memref<1x128xf32, #tpu.memory_space<vmem>>, %arg4: memref<4x128xf32, #tpu.memory_space<vmem>>) attributes {dimension_semantics = [], scalar_prefetch = 0 : i64, scratch_operands = 0 : i64, tpu.core_type = #tpu.core_type<tc>} {
    %c0 = arith.constant 0 : index
    %c0_0 = arith.constant 0 : index
    %0 = vector.load %arg0[%c0, %c0_0] : memref<4x1xi32, #tpu.memory_space<vmem>>, vector<4x1xi32>
    %1 = tpu.iota {dimensions = array<i32: 1>} : vector<4x128xi32>
    %2 = vector.broadcast %0 : vector<4x1xi32> to vector<4x128xi32>
    %3 = arith.cmpi eq, %1, %2 : vector<4x128xi32>
    %4 = arith.extui %3 : vector<4x128xi1> to vector<4x128xi32>
    %5 = arith.sitofp %4 : vector<4x128xi32> to vector<4x128xf32>
    %c0_1 = arith.constant 0 : index
    %c0_2 = arith.constant 0 : index
    %6 = vector.load %arg1[%c0_1, %c0_2] : memref<128x128xf32, #tpu.memory_space<vmem>>, vector<128x128xf32>
    %cst = arith.constant dense<0.000000e+00> : vector<4x128xf32>
    %7 = tpu.matmul %5, %6, %cst {dimension_numbers = #tpu.dot_dimension_numbers<[1], [0], [0], [1], [0, 0, 1, 1], [], []>} : vector<4x128xf32>, vector<128x128xf32>, vector<4x128xf32> -> vector<4x128xf32>
    %8 = math.tanh %7 : vector<4x128xf32>
    %c0_3 = arith.constant 0 : index
    %c0_4 = arith.constant 0 : index
    %9 = vector.load %arg2[%c0_3, %c0_4] : memref<128x128xf32, #tpu.memory_space<vmem>>, vector<128x128xf32>
    %cst_5 = arith.constant dense<0.000000e+00> : vector<4x128xf32>
    %10 = tpu.matmul %8, %9, %cst_5 {dimension_numbers = #tpu.dot_dimension_numbers<[1], [0], [0], [1], [0, 0, 1, 1], [], []>} : vector<4x128xf32>, vector<128x128xf32>, vector<4x128xf32> -> vector<4x128xf32>
    %c0_6 = arith.constant 0 : index
    %c0_7 = arith.constant 0 : index
    %11 = vector.load %arg3[%c0_6, %c0_7] : memref<1x128xf32, #tpu.memory_space<vmem>>, vector<1x128xf32>
    %12 = vector.broadcast %11 : vector<1x128xf32> to vector<4x128xf32>
    %13 = arith.addf %10, %12 : vector<4x128xf32>
    %c0_8 = arith.constant 0 : index
    %c0_9 = arith.constant 0 : index
    %14 = vector.load %arg4[%c0_8, %c0_9] : memref<4x128xf32, #tpu.memory_space<vmem>>, vector<4x128xf32>
    tpu.vector_store %arg4[%c0_8, %c0_9], %13 {strides = array<i32>} : memref<4x128xf32, #tpu.memory_space<vmem>>, vector<4x128xf32>,
    return
  }
}

</mosaic_0001>

<bundles_post_ra>
// kernel: slp_forward.1
= control target key start
LH: loop header
LB: loop body
LE: loop exit
PB: predicated region body
PF: predicated region fallthrough
CT: control target
= control target key end

     0   :  { %9 = vsyncpa [#allocation3], 0  ;;  %s585_s0 = inlined_call_operand.vmem [shape: s32[4,1], index: 0, kind: input, shape index: {}]   ;;  %s586_s1 = inlined_call_operand.hbm [shape: f32[128,128], index: 1, kind: input, shape index: {}]   ;;  %s587_s2 = inlined_call_operand.hbm [shape: f32[128,128], index: 2, kind: input, shape index: {}]   ;;  %s588_s3 = inlined_call_operand.vmem [shape: f32[1,128], index: 3, kind: input, shape index: {}]   ;;  %s589_s4 = inlined_call_operand.hbm [shape: f32[4,128], index: 4, kind: output, shape index: {}]  }
   0x1   :  { %10 = vsyncpa [#allocation6], 0 }
   0x2   :  { %11 = vsyncpa [#allocation4], 0  ;;  %s492_s15 = smov [#allocation2]   ;;  %s420_s19 = scalar_lea.hbm %s586_s1, 2048 }
   0x3   :  { %s19_s16 = sshll.u32 %s492_s15, 4  ;;  %p421_p0 = scmp.ne.s32.totalorder %s586_s1, %s420_s19  ;;  %s20_s16 = int_to_ptr.vmem [resolvable:$true] %s19_s16 }
   0x4   :  { %p424_p1 = scmp.lt.u32.totalorder %s420_s19, %s586_s1 }
   0x6   :  { %p426_p2 = pnand %p424_p1, %p421_p0 }
   0x8   :  { %429 = shalt.err (!%p426_p2)
}
   0x9   :  { %s430_s24 = scalar_lea.vmem %s20_s16, 2048  ;;  %p435_p4 = scmp.lt.s32.totalorder %s20_s16, %s20_s16 }
   0xa   :  { %p431_p3 = scmp.ne.s32.totalorder %s20_s16, %s430_s24  ;;  %p436_p5 = scmp.lt.s32.totalorder %s430_s24, %s430_s24 }
   0xc   :  { %p437_p6 = por %p436_p5, %p435_p4 }
   0xe   :  { %p438_p7 = pnand %p437_p6, %p431_p3 }
  0x10   :  { %441 = shalt.err (!%p438_p7)
}
  0x11   :  { %s493_s25 = smov 128   ;;  %s494_s26 = smov 8  }
  0x12   :  { %25 = dma.hbm_to_vmem [thread:$0]  %s586_s1, 2048, %s20_s16, [#allocation3], %s493_s25, %s493_s25, %s494_s26  }
  0x13   :  { %s495_s29 = smov [#allocation5]   ;;  %s442_s7 = scalar_lea.hbm %s587_s2, 2048 }
  0x14   :  { %s31_s30 = sshll.u32 %s495_s29, 4  ;;  %p443_p8 = scmp.ne.s32.totalorder %s587_s2, %s442_s7  ;;  %s32_s30 = int_to_ptr.vmem [resolvable:$true] %s31_s30 }
  0x15   :  { %p446_p9 = scmp.lt.u32.totalorder %s442_s7, %s587_s2 }
  0x17   :  { %p448_p10 = pnand %p446_p9, %p443_p8 }
  0x19   :  { %451 = shalt.err (!%p448_p10)
}
  0x1a   :  { %s452_s12 = scalar_lea.vmem %s32_s30, 2048  ;;  %p457_p12 = scmp.lt.s32.totalorder %s32_s30, %s32_s30 }
  0x1b   :  { %p453_p11 = scmp.ne.s32.totalorder %s32_s30, %s452_s12  ;;  %p458_p13 = scmp.lt.s32.totalorder %s452_s12, %s452_s12 }
  0x1d   :  { %p459_p0 = por %p458_p13, %p457_p12 }
  0x1f   :  { %p460_p1 = pnand %p459_p0, %p453_p11 }
  0x21   :  { %463 = shalt.err (!%p460_p1)
}
  0x22   :  { %37 = dma.hbm_to_vmem [thread:$0]  %s587_s2, 2048, %s32_s30, [#allocation6], %s493_s25, %s493_s25, %s494_s26  }
  0x23   :  { %486 = dma.done.wait [#allocation3], 2048  }
  0x24   :  { %487 = vsyncadd [#allocation3], 4294965248 }
  0x25   :  { %488 = dma.done.wait [#allocation6], 2048  }
  0x26   :  { %489 = vsyncadd [#allocation6], 4294965248  ;;  %v496_v0 = vmov 0   ;;  %v497_v1 = vmov 0.0|0.0   ;;  %v46_v2 = vld [vmem:[%s585_s0] sm:$0xf]  ;;  %v47_v43 = vlaneseq }
  0x27   :  { %417 = vset.pattern.permute.xlu0 %v496_v0  ;;  %359 = vmatprep.subr.bf16.mxu0 %v497_v1  ;;  %v55_v3 = vld [vmem:[#allocation2] sm:$0xff]  ;;  %v56_v4 = vld [vmem:[#allocation2 + $0x8] sm:$0xff]  ;;  %v57_v6 = vld [vmem:[#allocation2 + $0x10] sm:$0xff]  ;;  %vm498_vm0 = vmmov 0   ;;  %v499_v8 = vmov 0.0   ;;  %v500_v46 = vmov 1.0  }
  0x28   :  { %383 = vmatprep.subr.bf16.mxu1 %v497_v1  ;;  %50 = vperm.xlu0 %417, %v46_v2   ;;  %v360_v5 = vpack.c.bf16 %v56_v4, %v55_v3  ;;  %v58_v7 = vld [vmem:[#allocation2 + $0x18] sm:$0xff]  ;;  %v59_v10 = vld [vmem:[#allocation2 + $0x20] sm:$0xff]  ;;  %v60_v11 = vld [vmem:[#allocation2 + $0x28] sm:$0xff]  ;;  %v48_v44 = vand.u32 127, %v47_v43  ;;  %s501_s16 = smov [#allocation7]  }
  0x29   :  { %321 = vmatprep.mubr.msk.f32.mxu0 %vm498_vm0, %v499_v8  ;;  %356 = vmatprep.mubr.msk.f32.mxu1 %vm498_vm0, %v499_v8  ;;  %v363_v9 = vpack.c.bf16 %v58_v7, %v57_v6  ;;  %v142_v12 = vld [vmem:[#allocation5] sm:$0xff]  ;;  %v143_v13 = vld [vmem:[#allocation5 + $0x8] sm:$0xff]  ;;  %v144_v14 = vld [vmem:[#allocation5 + $0x10] sm:$0xff]  ;;  %v366_v16 = vpack.c.bf16 %v60_v11, %v59_v10  ;;  %s242_s17 = sshll.u32 %s501_s16, 4  ;;  %s243_s17 = int_to_ptr.vmem [resolvable:$true] %s242_s17 }
  0x2a   :  { %361 = vmatpush3.bf16.msra.mxu0 %v360_v5  ;;  %v145_v15 = vld [vmem:[#allocation5 + $0x18] sm:$0xff]  ;;  %v384_v17 = vpack.c.bf16 %v143_v13, %v142_v12  ;;  %v61_v18 = vld [vmem:[#allocation2 + $0x30] sm:$0xff]  ;;  %v146_v21 = vld [vmem:[#allocation5 + $0x20] sm:$0xff]  ;;  %s464_s18 = scalar_lea.vmem %s243_s17, 64  ;;  %p469_p3 = scmp.lt.s32.totalorder %s243_s17, %s243_s17 }
  0x2b   :  { %362 = vmatprep.subr.bf16.mxu0 %v497_v1  ;;  %v62_v19 = vld [vmem:[#allocation2 + $0x38] sm:$0xff]  ;;  %v387_v20 = vpack.c.bf16 %v145_v15, %v144_v14  ;;  %v147_v22 = vld [vmem:[#allocation5 + $0x28] sm:$0xff]  ;;  %v63_v24 = vld [vmem:[#allocation2 + $0x40] sm:$0xff]  ;;  %p465_p2 = scmp.ne.s32.totalorder %s243_s17, %s464_s18  ;;  %p470_p4 = scmp.lt.s32.totalorder %s464_s18, %s464_s18 }
  0x2c   :  { %385 = vmatpush3.bf16.msra.mxu1 %v384_v17  ;;  %v369_v23 = vpack.c.bf16 %v62_v19, %v61_v18  ;;  %v64_v25 = vld [vmem:[#allocation2 + $0x48] sm:$0xff]  ;;  %v390_v26 = vpack.c.bf16 %v147_v22, %v146_v21  ;;  %v148_v27 = vld [vmem:[#allocation5 + $0x30] sm:$0xff]  ;;  %v149_v28 = vld [vmem:[#allocation5 + $0x38] sm:$0xff] }
  0x2d   :  { %386 = vmatprep.subr.bf16.mxu1 %v497_v1  ;;  %v372_v29 = vpack.c.bf16 %v64_v25, %v63_v24  ;;  %v65_v30 = vld [vmem:[#allocation2 + $0x50] sm:$0xff]  ;;  %v66_v31 = vld [vmem:[#allocation2 + $0x58] sm:$0xff]  ;;  %v393_v32 = vpack.c.bf16 %v149_v28, %v148_v27  ;;  %v150_v33 = vld [vmem:[#allocation5 + $0x40] sm:$0xff]  ;;  %p471_p5 = por %p470_p4, %p469_p3 }
  0x2e   :  { %364 = vmatpush3.bf16.msra.mxu0 %v363_v9  ;;  %v151_v34 = vld [vmem:[#allocation5 + $0x48] sm:$0xff]  ;;  %v375_v35 = vpack.c.bf16 %v66_v31, %v65_v30  ;;  %v67_v36 = vld [vmem:[#allocation2 + $0x60] sm:$0xff]  ;;  %v69_v40 = vld [vmem:[#allocation2 + $0x70] sm:$0xff] }
  0x2f   :  { %365 = vmatprep.subr.bf16.mxu0 %v497_v1  ;;  %v68_v37 = vld [vmem:[#allocation2 + $0x68] sm:$0xff]  ;;  %v396_v38 = vpack.c.bf16 %v151_v34, %v150_v33  ;;  %v70_v41 = vld [vmem:[#allocation2 + $0x78] sm:$0xff]  ;;  %v152_v47 = vld [vmem:[#allocation5 + $0x50] sm:$0xff]  ;;  %p472_p6 = pnand %p471_p5, %p465_p2 }
  0x30   :  { %388 = vmatpush3.bf16.msra.mxu1 %v387_v20  ;;  %v378_v39 = vpack.c.bf16 %v68_v37, %v67_v36  ;;  %v381_v42 = vpack.c.bf16 %v70_v41, %v69_v40  ;;  %v153_v48 = vld [vmem:[#allocation5 + $0x58] sm:$0xff]  ;;  %v154_v50 = vld [vmem:[#allocation5 + $0x60] sm:$0xff]  ;;  %v155_v51 = vld [vmem:[#allocation5 + $0x68] sm:$0xff] }
  0x31   :  { %389 = vmatprep.subr.bf16.mxu1 %v497_v1  ;;  %v399_v49 = vpack.c.bf16 %v153_v48, %v152_v47  ;;  %v402_v52 = vpack.c.bf16 %v155_v51, %v154_v50  ;;  %v156_v53 = vld [vmem:[#allocation5 + $0x70] sm:$0xff]  ;;  %v157_v54 = vld [vmem:[#allocation5 + $0x78] sm:$0xff] }
  0x32   :  { %367 = vmatpush3.bf16.msra.mxu0 %v366_v16  ;;  %v405_v55 = vpack.c.bf16 %v157_v54, %v156_v53  ;;  %v254_v59 = vld [vmem:[%s588_s3] ss:$0 sm:$0xff] }
  0x33   :  { %368 = vmatprep.subr.bf16.mxu0 %v497_v1 }
  0x34   :  { %391 = vmatpush3.bf16.msra.mxu1 %v390_v26 }
  0x35   :  { %392 = vmatprep.subr.bf16.mxu1 %v497_v1 }
  0x36   :  { %370 = vmatpush3.bf16.msra.mxu0 %v369_v23 }
  0x37   :  { %371 = vmatprep.subr.bf16.mxu0 %v497_v1 }
  0x38   :  { %394 = vmatpush3.bf16.msra.mxu1 %v393_v32 }
  0x39   :  { %395 = vmatprep.subr.bf16.mxu1 %v497_v1 }
  0x3a   :  { %373 = vmatpush3.bf16.msra.mxu0 %v372_v29 }
  0x3b   :  { %374 = vmatprep.subr.bf16.mxu0 %v497_v1 }
  0x3c   :  { %397 = vmatpush3.bf16.msra.mxu1 %v396_v38 }
  0x3d   :  { %398 = vmatprep.subr.bf16.mxu1 %v497_v1 }
  0x3e   :  { %376 = vmatpush3.bf16.msra.mxu0 %v375_v35 }
  0x3f   :  { %377 = vmatprep.subr.bf16.mxu0 %v497_v1 }
  0x40   :  { %400 = vmatpush3.bf16.msra.mxu1 %v399_v49 }
  0x41   :  { %401 = vmatprep.subr.bf16.mxu1 %v497_v1 }
  0x42   :  { %379 = vmatpush3.bf16.msra.mxu0 %v378_v39 }
  0x43   :  { %380 = vmatprep.subr.bf16.mxu0 %v497_v1 }
  0x44   :  { %403 = vmatpush3.bf16.msra.mxu1 %v402_v52 }
  0x45   :  { %404 = vmatprep.subr.bf16.mxu1 %v497_v1 }
  0x46   :  { %382 = vmatpush3.bf16.msra.mxu0 %v381_v42 }
  0x48   :  { %406 = vmatpush3.bf16.msra.mxu1 %v405_v55 }
  0xa7   :  { %v51_v45 = vpop.permute.xlu0 %50 }
  0xa8   :  { %vm52_vm1 = vcmp.eq.s32.totalorder %v48_v44, %v51_v45 }
  0xa9   :  { %322 = vmatmul.mubr.msk.f32.vlgmr.msra.gmra.mrb[0].mxu0 %vm52_vm1, %v500_v46 }
 0x17c   :  { %v137_v56 = vpop.f32.mrb[0].mxu0 }
 0x17d   :  { %418 = vtanh.f32 %v137_v56  ;;  %v323_v57 = vpop.f32.mrb[1].mxu0 }
 0x187   :  { %v419_v58 = vpop.eup %418 }
 0x188   :  { %357 = vmatmul.mubr.f32.vlgmr.msra.gmra.mrb[0].mxu1 %v419_v58 }
 0x25b   :  { %v231_v60 = vpop.f32.mrb[0].mxu1 }
 0x25c   :  { %v232_v61 = vadd.f32 %v254_v59, %v231_v60  ;;  %v358_v62 = vpop.f32.mrb[1].mxu1 }
 0x25e   :  { %235 = vst [vmem:[#allocation7] sm:$0xf] %v232_v61 }
 0x25f   :  { %475 = shalt.err (!%p472_p6)
}
 0x260   :  { %s476_s21 = scalar_lea.hbm %s589_s4, 64 }
 0x261   :  { %p477_p7 = scmp.ne.s32.totalorder %s589_s4, %s476_s21  ;;  %p480_p8 = scmp.lt.u32.totalorder %s476_s21, %s589_s4 }
 0x263   :  { %p482_p9 = pnand %p480_p8, %p477_p7 }
 0x265   :  { %485 = shalt.err (!%p482_p9)
}
 0x266   :  { %245 = dma.vmem_to_hbm [thread:$0]  %s243_s17, 64, %s589_s4, [#allocation4]  }
 0x267   :  { %490 = dma.done.wait [#allocation4], 64  }
 0x268   :  { %491 = vsyncadd [#allocation4], 4294967232 }
 0x269   :  { %249 = vsyncpa [#allocation3], 1 }
 0x26a   :  { %250 = vsyncpa [#allocation6], 1 }
 0x26b   :  { %251 = vsyncpa [#allocation4], 1 }

</bundles_post_ra>
